<compile_context>
chip_gen: v6e
topology: v6e:2x2x1
jax: 0.10.0
libtpu: 0.0.40
codegen_flags: <defaults>
</compile_context>

<pallas_src>
import numpy as np

import jax
import jax.numpy as jnp
from jax.experimental import pallas as pl
from jax.experimental.pallas import tpu as pltpu


# ----------------------------------------------------------------------------
# Counter-based standard-normal noise (pure jnp -> lowers on Mosaic & interpret)
# ----------------------------------------------------------------------------

def _wrap_i32(v):
    """Python int -> two's-complement int32 value."""
    v &= 0xFFFFFFFF
    return v - (1 << 32) if v >= (1 << 31) else v


def _shr_logical(x, k):
    """Logical right shift for int32 (arithmetic shift + mask)."""
    return (x >> k) & jnp.int32((1 << (32 - k)) - 1)


def _mix32(x):
    """lowbias32 avalanche hash (Wellons), int32 with wrapping arithmetic."""
    x = x ^ _shr_logical(x, 16)
    x = x * jnp.int32(_wrap_i32(0x7FEB352D))
    x = x ^ _shr_logical(x, 15)
    x = x * jnp.int32(_wrap_i32(0x846CA68B))
    x = x ^ _shr_logical(x, 16)
    return x


def _erfinv_f32(x):
    """Single-precision erfinv (Giles 2012): 1 log + 1 sqrt + FMA polynomial."""
    w = -jnp.log((1.0 - x) * (1.0 + x))
    # central branch (w < 5)
    wc = w - 2.5
    pc = jnp.float32(2.81022636e-08)
    for c in (3.43273939e-07, -3.5233877e-06, -4.39150654e-06, 0.00021858087,
              -0.00125372503, -0.00417768164, 0.246640727, 1.50140941):
        pc = jnp.float32(c) + pc * wc
    # tail branch (w >= 5)
    wt = jnp.sqrt(w) - 3.0
    pt = jnp.float32(-0.000200214257)
    for c in (0.000100950558, 0.00134934322, -0.00367342844, 0.00573950773,
              -0.0076224613, 0.00943887047, 1.00167406, 2.83297682):
        pt = jnp.float32(c) + pt * wt
    return jnp.where(w < 5.0, pc, pt) * x


def _normal_from_index(seed, flat_idx):
    """Standard-normal noise as a pure function of (seed, global flat index).

    Grid- and tile-layout invariant: the same (seed, element) pair always
    yields the same value regardless of block_rows / which core ran it.
    """
    key = _mix32(seed ^ jnp.int32(_wrap_i32(0x9E3779B9)))
    bits = _mix32(flat_idx ^ key)
    bits = _mix32(bits + key)                       # second round for quality
    bits24 = _shr_logical(bits, 8)                  # 24 uniform bits
    u = (bits24.astype(jnp.float32) + 0.5) * jnp.float32(1.0 / (1 << 24))
    x = 2.0 * u - 1.0                               # uniform in (-1, 1)
    return jnp.float32(1.4142135623730951) * _erfinv_f32(x)


# ----------------------------------------------------------------------------
# Kernels
# ----------------------------------------------------------------------------

def _sample_block(seed_ref, mu_ref, logvar_ref):
    rows, lanes = mu_ref.shape
    base = pl.program_id(0) * (rows * lanes)        # global flat offset of block
    r = jax.lax.broadcasted_iota(jnp.int32, (rows, lanes), 0)
    c = jax.lax.broadcasted_iota(jnp.int32, (rows, lanes), 1)
    flat_idx = base + r * lanes + c
    eps = _normal_from_index(seed_ref[0], flat_idx)
    std = jnp.exp(0.5 * logvar_ref[...].astype(jnp.float32))
    v = mu_ref[...].astype(jnp.float32) + eps * std
    return v, eps


def _sampler_kernel(seed_ref, mu_ref, logvar_ref, v_ref):
    v, _ = _sample_block(seed_ref, mu_ref, logvar_ref)
    v_ref[...] = v.astype(v_ref.dtype)


def _sampler_kernel_with_eps(seed_ref, mu_ref, logvar_ref, v_ref, eps_ref):
    v, eps = _sample_block(seed_ref, mu_ref, logvar_ref)
    v_ref[...] = v.astype(v_ref.dtype)
    eps_ref[...] = eps.astype(eps_ref.dtype)


# ----------------------------------------------------------------------------
# Wrapper
# ----------------------------------------------------------------------------

def sampler_pallas(mu, logvar, seed=0, *, return_eps=False,
                   lane_width=512, block_bytes_per_operand=2 << 20):
    """Pallas equivalent of Sampler.forward(mu, logvar).

    mu, logvar : (batch, dim) arrays of the same shape/dtype.
    Returns v (and optionally eps, emitted in mu.dtype) of shape (batch, dim).
    """
    assert mu.shape == logvar.shape and mu.ndim == 2
    orig_shape = mu.shape
    B, D = mu.shape
    N = B * D
    L = lane_width

    # Flatten to a lane-dense (rows, L) slab (metadata-only when no pad needed).
    rows0 = -(-N // L)                                    # cdiv
    rows_budget = max(8, (block_bytes_per_operand // (L * 4)) // 8 * 8)
    block_rows = min(rows_budget, ((rows0 + 7) // 8) * 8)
    R = -(-rows0 // block_rows) * block_rows              # pad rows so grid divides
    n_pad = R * L - N

    mu_f = mu.reshape(-1)
    lv_f = logvar.reshape(-1)
    if n_pad:
        mu_f = jnp.pad(mu_f, (0, n_pad))
        lv_f = jnp.pad(lv_f, (0, n_pad))
    mu2 = mu_f.reshape(R, L)
    lv2 = lv_f.reshape(R, L)

    grid = (R // block_rows,)
    blk = pl.BlockSpec((block_rows, L), lambda i, seed_ref: (i, 0))
    seed_arr = jnp.asarray([seed], dtype=jnp.int32)

    if return_eps:
        kernel = _sampler_kernel_with_eps
        out_shape = (jax.ShapeDtypeStruct((R, L), mu.dtype),
                     jax.ShapeDtypeStruct((R, L), mu.dtype))   # eps in mu.dtype
        out_specs = (blk, blk)
    else:
        kernel = _sampler_kernel
        out_shape = (jax.ShapeDtypeStruct((R, L), mu.dtype),)
        out_specs = (blk,)

    outs = pl.pallas_call(
        kernel,
        out_shape=out_shape,
        grid_spec=pltpu.PrefetchScalarGridSpec(
            num_scalar_prefetch=1,
            grid=grid,
            in_specs=[blk, blk],
            out_specs=out_specs,
        ),
        compiler_params=pltpu.CompilerParams(
            dimension_semantics=("parallel",)),
    )(seed_arr, mu2, lv2)

    def _unflatten(a):
        a = a.reshape(-1)
        if n_pad:
            a = a[:N]
        return a.reshape(orig_shape)

    if return_eps:
        v, eps = outs
        return _unflatten(v), _unflatten(eps)
    (v,) = outs
    return _unflatten(v)


# ----------------------------------------------------------------------------
# Self-test
# ----------------------------------------------------------------------------

if __name__ == "__main__":
    # Small shapes matching the module's (batch, dim) contract; D=32 exercises
    # the lane-densifying flatten/pad path.
    batch, dim = 2, 32
    key = jax.random.PRNGKey(0)
    kmu, klv = jax.random.split(key)
    mu = jax.random.normal(kmu, (batch, dim), dtype=jnp.float32)
    logvar = 0.5 * jax.random.normal(klv, (batch, dim), dtype=jnp.float32)

    v, eps = sampler_pallas(mu, logvar, seed=0, return_eps=True)
    v = np.asarray(jax.block_until_ready(v))
    eps = np.asarray(jax.block_until_ready(eps))

    v_expected = np.asarray(mu) + eps * np.exp(0.5 * np.asarray(logvar))
    np.testing.assert_allclose(v, v_expected, rtol=1e-4, atol=1e-4)
    assert v.shape == (batch, dim)
    assert np.all(np.isfinite(eps))

    # Default (bandwidth-optimized) path: no eps writeback, same values.
    v_only = np.asarray(jax.block_until_ready(sampler_pallas(mu, logvar, seed=0)))
    np.testing.assert_allclose(v_only, v, rtol=1e-6, atol=1e-6)

    # Larger run: same kernel, single lane-dense block; check noise statistics.
    B2, D2 = 512, 256
    k2, k3 = jax.random.split(jax.random.PRNGKey(1))
    mu2 = jax.random.normal(k2, (B2, D2), dtype=jnp.float32)
    lv2 = jax.random.normal(k3, (B2, D2), dtype=jnp.float32)
    v2, eps2 = sampler_pallas(mu2, lv2, seed=7, return_eps=True)
    v2 = np.asarray(jax.block_until_ready(v2))
    eps2 = np.asarray(jax.block_until_ready(eps2))

    np.testing.assert_allclose(
        v2, np.asarray(mu2) + eps2 * np.exp(0.5 * np.asarray(lv2)),
        rtol=1e-4, atol=1e-4)
    assert np.all(np.isfinite(eps2))
    assert abs(float(eps2.mean())) < 0.05
    assert 0.9 < float(eps2.std()) < 1.1

    print("KERNEL_OK")
</pallas_src>

<mosaic_0001>
module attributes {stable_mosaic.version = 11 : i64} {
  func.func @_sampler_kernel_with_eps(%arg0: i32, %arg1: memref<1xi32, #tpu.memory_space<smem>>, %arg2: memref<8x512xf32, #tpu.memory_space<vmem>>, %arg3: memref<8x512xf32, #tpu.memory_space<vmem>>, %arg4: memref<8x512xf32, #tpu.memory_space<vmem>>, %arg5: memref<8x512xf32, #tpu.memory_space<vmem>>) attributes {dimension_semantics = [#tpu.dimension_semantics<parallel>], iteration_bounds = array<i64: 1>, scalar_prefetch = 1 : i64, scratch_operands = 0 : i64, tpu.core_type = #tpu.core_type<tc>, window_params = [{transform_indices = @transform_0, window_bounds = array<i64: 8, 512>}, {transform_indices = @transform_1, window_bounds = array<i64: 8, 512>}, {transform_indices = @transform_2, window_bounds = array<i64: 8, 512>}, {transform_indices = @transform_3, window_bounds = array<i64: 8, 512>}]} {
    %c4096_i32 = arith.constant 4096 : i32
    %0 = arith.muli %arg0, %c4096_i32 : i32
    %1 = tpu.iota {dimensions = array<i32: 0>} : vector<8x512xi32>
    %2 = tpu.iota {dimensions = array<i32: 1>} : vector<8x512xi32>
    %c512_i32 = arith.constant 512 : i32
    %3 = vector.broadcast %c512_i32 : i32 to vector<8x512xi32>
    %4 = arith.muli %1, %3 : vector<8x512xi32>
    %5 = vector.broadcast %0 : i32 to vector<8x512xi32>
    %6 = arith.addi %5, %4 : vector<8x512xi32>
    %7 = arith.addi %6, %2 : vector<8x512xi32>
    %c0 = arith.constant 0 : index
    %8 = memref.load %arg1[%c0] : memref<1xi32, #tpu.memory_space<smem>>
    %c-1640531527_i32 = arith.constant -1640531527 : i32
    %9 = arith.xori %8, %c-1640531527_i32 : i32
    %c16_i32 = arith.constant 16 : i32
    %10 = arith.shrsi %9, %c16_i32 : i32
    %c65535_i32 = arith.constant 65535 : i32
    %11 = arith.andi %10, %c65535_i32 : i32
    %12 = arith.xori %9, %11 : i32
    %c2146121005_i32 = arith.constant 2146121005 : i32
    %13 = arith.muli %12, %c2146121005_i32 : i32
    %c15_i32 = arith.constant 15 : i32
    %14 = arith.shrsi %13, %c15_i32 : i32
    %c131071_i32 = arith.constant 131071 : i32
    %15 = arith.andi %14, %c131071_i32 : i32
    %16 = arith.xori %13, %15 : i32
    %c-2073254261_i32 = arith.constant -2073254261 : i32
    %17 = arith.muli %16, %c-2073254261_i32 : i32
    %c16_i32_0 = arith.constant 16 : i32
    %18 = arith.shrsi %17, %c16_i32_0 : i32
    %c65535_i32_1 = arith.constant 65535 : i32
    %19 = arith.andi %18, %c65535_i32_1 : i32
    %20 = arith.xori %17, %19 : i32
    %21 = vector.broadcast %20 : i32 to vector<8x512xi32>
    %22 = arith.xori %7, %21 : vector<8x512xi32>
    %c16_i32_2 = arith.constant 16 : i32
    %23 = vector.broadcast %c16_i32_2 : i32 to vector<8x512xi32>
    %24 = arith.shrsi %22, %23 : vector<8x512xi32>
    %c65535_i32_3 = arith.constant 65535 : i32
    %25 = vector.broadcast %c65535_i32_3 : i32 to vector<8x512xi32>
    %26 = arith.andi %24, %25 : vector<8x512xi32>
    %27 = arith.xori %22, %26 : vector<8x512xi32>
    %c2146121005_i32_4 = arith.constant 2146121005 : i32
    %28 = vector.broadcast %c2146121005_i32_4 : i32 to vector<8x512xi32>
    %29 = arith.muli %27, %28 : vector<8x512xi32>
    %c15_i32_5 = arith.constant 15 : i32
    %30 = vector.broadcast %c15_i32_5 : i32 to vector<8x512xi32>
    %31 = arith.shrsi %29, %30 : vector<8x512xi32>
    %c131071_i32_6 = arith.constant 131071 : i32
    %32 = vector.broadcast %c131071_i32_6 : i32 to vector<8x512xi32>
    %33 = arith.andi %31, %32 : vector<8x512xi32>
    %34 = arith.xori %29, %33 : vector<8x512xi32>
    %c-2073254261_i32_7 = arith.constant -2073254261 : i32
    %35 = vector.broadcast %c-2073254261_i32_7 : i32 to vector<8x512xi32>
    %36 = arith.muli %34, %35 : vector<8x512xi32>
    %c16_i32_8 = arith.constant 16 : i32
    %37 = vector.broadcast %c16_i32_8 : i32 to vector<8x512xi32>
    %38 = arith.shrsi %36, %37 : vector<8x512xi32>
    %c65535_i32_9 = arith.constant 65535 : i32
    %39 = vector.broadcast %c65535_i32_9 : i32 to vector<8x512xi32>
    %40 = arith.andi %38, %39 : vector<8x512xi32>
    %41 = arith.xori %36, %40 : vector<8x512xi32>
    %42 = vector.broadcast %20 : i32 to vector<8x512xi32>
    %43 = arith.addi %41, %42 : vector<8x512xi32>
    %c16_i32_10 = arith.constant 16 : i32
    %44 = vector.broadcast %c16_i32_10 : i32 to vector<8x512xi32>
    %45 = arith.shrsi %43, %44 : vector<8x512xi32>
    %c65535_i32_11 = arith.constant 65535 : i32
    %46 = vector.broadcast %c65535_i32_11 : i32 to vector<8x512xi32>
    %47 = arith.andi %45, %46 : vector<8x512xi32>
    %48 = arith.xori %43, %47 : vector<8x512xi32>
    %c2146121005_i32_12 = arith.constant 2146121005 : i32
    %49 = vector.broadcast %c2146121005_i32_12 : i32 to vector<8x512xi32>
    %50 = arith.muli %48, %49 : vector<8x512xi32>
    %c15_i32_13 = arith.constant 15 : i32
    %51 = vector.broadcast %c15_i32_13 : i32 to vector<8x512xi32>
    %52 = arith.shrsi %50, %51 : vector<8x512xi32>
    %c131071_i32_14 = arith.constant 131071 : i32
    %53 = vector.broadcast %c131071_i32_14 : i32 to vector<8x512xi32>
    %54 = arith.andi %52, %53 : vector<8x512xi32>
    %55 = arith.xori %50, %54 : vector<8x512xi32>
    %c-2073254261_i32_15 = arith.constant -2073254261 : i32
    %56 = vector.broadcast %c-2073254261_i32_15 : i32 to vector<8x512xi32>
    %57 = arith.muli %55, %56 : vector<8x512xi32>
    %c16_i32_16 = arith.constant 16 : i32
    %58 = vector.broadcast %c16_i32_16 : i32 to vector<8x512xi32>
    %59 = arith.shrsi %57, %58 : vector<8x512xi32>
    %c65535_i32_17 = arith.constant 65535 : i32
    %60 = vector.broadcast %c65535_i32_17 : i32 to vector<8x512xi32>
    %61 = arith.andi %59, %60 : vector<8x512xi32>
    %62 = arith.xori %57, %61 : vector<8x512xi32>
    %c8_i32 = arith.constant 8 : i32
    %63 = vector.broadcast %c8_i32 : i32 to vector<8x512xi32>
    %64 = arith.shrsi %62, %63 : vector<8x512xi32>
    %c16777215_i32 = arith.constant 16777215 : i32
    %65 = vector.broadcast %c16777215_i32 : i32 to vector<8x512xi32>
    %66 = arith.andi %64, %65 : vector<8x512xi32>
    %67 = arith.sitofp %66 : vector<8x512xi32> to vector<8x512xf32>
    %cst = arith.constant 5.000000e-01 : f32
    %68 = vector.broadcast %cst : f32 to vector<8x512xf32>
    %69 = arith.addf %67, %68 : vector<8x512xf32>
    %cst_18 = arith.constant 5.96046448E-8 : f32
    %70 = vector.broadcast %cst_18 : f32 to vector<8x512xf32>
    %71 = arith.mulf %69, %70 : vector<8x512xf32>
    %cst_19 = arith.constant 2.000000e+00 : f32
    %72 = vector.broadcast %cst_19 : f32 to vector<8x512xf32>
    %73 = arith.mulf %72, %71 : vector<8x512xf32>
    %cst_20 = arith.constant 1.000000e+00 : f32
    %74 = vector.broadcast %cst_20 : f32 to vector<8x512xf32>
    %75 = arith.subf %73, %74 : vector<8x512xf32>
    %cst_21 = arith.constant 1.000000e+00 : f32
    %76 = vector.broadcast %cst_21 : f32 to vector<8x512xf32>
    %77 = arith.subf %76, %75 : vector<8x512xf32>
    %cst_22 = arith.constant 1.000000e+00 : f32
    %78 = vector.broadcast %cst_22 : f32 to vector<8x512xf32>
    %79 = arith.addf %78, %75 : vector<8x512xf32>
    %80 = arith.mulf %77, %79 : vector<8x512xf32>
    %81 = math.log %80 : vector<8x512xf32>
    %cst_23 = arith.constant 0.000000e+00 : f32
    %82 = vector.broadcast %cst_23 : f32 to vector<8x512xf32>
    %83 = arith.subf %82, %81 : vector<8x512xf32>
    %cst_24 = arith.constant 2.500000e+00 : f32
    %84 = vector.broadcast %cst_24 : f32 to vector<8x512xf32>
    %85 = arith.subf %83, %84 : vector<8x512xf32>
    %cst_25 = arith.constant 2.81022636E-8 : f32
    %86 = vector.broadcast %cst_25 : f32 to vector<8x512xf32>
    %87 = arith.mulf %86, %85 : vector<8x512xf32>
    %cst_26 = arith.constant 3.43273939E-7 : f32
    %88 = vector.broadcast %cst_26 : f32 to vector<8x512xf32>
    %89 = arith.addf %88, %87 : vector<8x512xf32>
    %90 = arith.mulf %89, %85 : vector<8x512xf32>
    %cst_27 = arith.constant -3.5233877E-6 : f32
    %91 = vector.broadcast %cst_27 : f32 to vector<8x512xf32>
    %92 = arith.addf %91, %90 : vector<8x512xf32>
    %93 = arith.mulf %92, %85 : vector<8x512xf32>
    %cst_28 = arith.constant -4.39150654E-6 : f32
    %94 = vector.broadcast %cst_28 : f32 to vector<8x512xf32>
    %95 = arith.addf %94, %93 : vector<8x512xf32>
    %96 = arith.mulf %95, %85 : vector<8x512xf32>
    %cst_29 = arith.constant 2.1858087E-4 : f32
    %97 = vector.broadcast %cst_29 : f32 to vector<8x512xf32>
    %98 = arith.addf %97, %96 : vector<8x512xf32>
    %99 = arith.mulf %98, %85 : vector<8x512xf32>
    %cst_30 = arith.constant -0.00125372503 : f32
    %100 = vector.broadcast %cst_30 : f32 to vector<8x512xf32>
    %101 = arith.addf %100, %99 : vector<8x512xf32>
    %102 = arith.mulf %101, %85 : vector<8x512xf32>
    %cst_31 = arith.constant -0.00417768164 : f32
    %103 = vector.broadcast %cst_31 : f32 to vector<8x512xf32>
    %104 = arith.addf %103, %102 : vector<8x512xf32>
    %105 = arith.mulf %104, %85 : vector<8x512xf32>
    %cst_32 = arith.constant 0.246640727 : f32
    %106 = vector.broadcast %cst_32 : f32 to vector<8x512xf32>
    %107 = arith.addf %106, %105 : vector<8x512xf32>
    %108 = arith.mulf %107, %85 : vector<8x512xf32>
    %cst_33 = arith.constant 1.50140941 : f32
    %109 = vector.broadcast %cst_33 : f32 to vector<8x512xf32>
    %110 = arith.addf %109, %108 : vector<8x512xf32>
    %111 = math.sqrt %83 : vector<8x512xf32>
    %cst_34 = arith.constant 3.000000e+00 : f32
    %112 = vector.broadcast %cst_34 : f32 to vector<8x512xf32>
    %113 = arith.subf %111, %112 : vector<8x512xf32>
    %cst_35 = arith.constant -2.00214257E-4 : f32
    %114 = vector.broadcast %cst_35 : f32 to vector<8x512xf32>
    %115 = arith.mulf %114, %113 : vector<8x512xf32>
    %cst_36 = arith.constant 1.00950558E-4 : f32
    %116 = vector.broadcast %cst_36 : f32 to vector<8x512xf32>
    %117 = arith.addf %116, %115 : vector<8x512xf32>
    %118 = arith.mulf %117, %113 : vector<8x512xf32>
    %cst_37 = arith.constant 0.00134934322 : f32
    %119 = vector.broadcast %cst_37 : f32 to vector<8x512xf32>
    %120 = arith.addf %119, %118 : vector<8x512xf32>
    %121 = arith.mulf %120, %113 : vector<8x512xf32>
    %cst_38 = arith.constant -0.00367342844 : f32
    %122 = vector.broadcast %cst_38 : f32 to vector<8x512xf32>
    %123 = arith.addf %122, %121 : vector<8x512xf32>
    %124 = arith.mulf %123, %113 : vector<8x512xf32>
    %cst_39 = arith.constant 0.00573950773 : f32
    %125 = vector.broadcast %cst_39 : f32 to vector<8x512xf32>
    %126 = arith.addf %125, %124 : vector<8x512xf32>
    %127 = arith.mulf %126, %113 : vector<8x512xf32>
    %cst_40 = arith.constant -0.0076224613 : f32
    %128 = vector.broadcast %cst_40 : f32 to vector<8x512xf32>
    %129 = arith.addf %128, %127 : vector<8x512xf32>
    %130 = arith.mulf %129, %113 : vector<8x512xf32>
    %cst_41 = arith.constant 0.00943887047 : f32
    %131 = vector.broadcast %cst_41 : f32 to vector<8x512xf32>
    %132 = arith.addf %131, %130 : vector<8x512xf32>
    %133 = arith.mulf %132, %113 : vector<8x512xf32>
    %cst_42 = arith.constant 1.00167406 : f32
    %134 = vector.broadcast %cst_42 : f32 to vector<8x512xf32>
    %135 = arith.addf %134, %133 : vector<8x512xf32>
    %136 = arith.mulf %135, %113 : vector<8x512xf32>
    %cst_43 = arith.constant 2.83297682 : f32
    %137 = vector.broadcast %cst_43 : f32 to vector<8x512xf32>
    %138 = arith.addf %137, %136 : vector<8x512xf32>
    %cst_44 = arith.constant 5.000000e+00 : f32
    %139 = vector.broadcast %cst_44 : f32 to vector<8x512xf32>
    %140 = arith.cmpf olt, %83, %139 : vector<8x512xf32>
    %141 = arith.select %140, %110, %138 : vector<8x512xi1>, vector<8x512xf32>
    %142 = arith.mulf %141, %75 : vector<8x512xf32>
    %cst_45 = arith.constant 1.41421354 : f32
    %143 = vector.broadcast %cst_45 : f32 to vector<8x512xf32>
    %144 = arith.mulf %143, %142 : vector<8x512xf32>
    %c0_46 = arith.constant 0 : index
    %c0_47 = arith.constant 0 : index
    %145 = vector.load %arg3[%c0_46, %c0_47] : memref<8x512xf32, #tpu.memory_space<vmem>>, vector<8x512xf32>
    %cst_48 = arith.constant 5.000000e-01 : f32
    %146 = vector.broadcast %cst_48 : f32 to vector<8x512xf32>
    %147 = arith.mulf %146, %145 : vector<8x512xf32>
    %148 = math.exp %147 : vector<8x512xf32>
    %c0_49 = arith.constant 0 : index
    %c0_50 = arith.constant 0 : index
    %149 = vector.load %arg2[%c0_49, %c0_50] : memref<8x512xf32, #tpu.memory_space<vmem>>, vector<8x512xf32>
    %150 = arith.mulf %144, %148 : vector<8x512xf32>
    %151 = arith.addf %149, %150 : vector<8x512xf32>
    %c0_51 = arith.constant 0 : index
    %c0_52 = arith.constant 0 : index
    %152 = vector.load %arg4[%c0_51, %c0_52] : memref<8x512xf32, #tpu.memory_space<vmem>>, vector<8x512xf32>
    tpu.vector_store %arg4[%c0_51, %c0_52], %151 {strides = array<i32>} : memref<8x512xf32, #tpu.memory_space<vmem>>, vector<8x512xf32>,
    %c0_53 = arith.constant 0 : index
    %c0_54 = arith.constant 0 : index
    %153 = vector.load %arg5[%c0_53, %c0_54] : memref<8x512xf32, #tpu.memory_space<vmem>>, vector<8x512xf32>
    tpu.vector_store %arg5[%c0_53, %c0_54], %144 {strides = array<i32>} : memref<8x512xf32, #tpu.memory_space<vmem>>, vector<8x512xf32>,
    return
  }
  func.func @transform_0(%arg0: i32, %arg1: memref<1xi32, #tpu.memory_space<smem>>) -> (i32, i32) {
    %c0_i32 = arith.constant 0 : i32
    %c0_i32_0 = arith.constant 0 : i32
    return %arg0, %c0_i32 : i32, i32
  }
  func.func @transform_1(%arg0: i32, %arg1: memref<1xi32, #tpu.memory_space<smem>>) -> (i32, i32) {
    %c0_i32 = arith.constant 0 : i32
    %c0_i32_0 = arith.constant 0 : i32
    return %arg0, %c0_i32 : i32, i32
  }
  func.func @transform_2(%arg0: i32, %arg1: memref<1xi32, #tpu.memory_space<smem>>) -> (i32, i32) {
    %c0_i32 = arith.constant 0 : i32
    %c0_i32_0 = arith.constant 0 : i32
    return %arg0, %c0_i32 : i32, i32
  }
  func.func @transform_3(%arg0: i32, %arg1: memref<1xi32, #tpu.memory_space<smem>>) -> (i32, i32) {
    %c0_i32 = arith.constant 0 : i32
    %c0_i32_0 = arith.constant 0 : i32
    return %arg0, %c0_i32 : i32, i32
  }
}

</mosaic_0001>

<bundles_post_ra>
// kernel: tpu_custom_call.1
= control target key start
LH: loop header
LB: loop body
LE: loop exit
PB: predicated region body
PF: predicated region fallthrough
CT: control target
= control target key end

     0   :  { %11 = vsyncpa [#allocation5], 0  ;;  %s816_s0 = inlined_call_operand.<no memory space> [shape: s32[1], index: 0, kind: input, shape index: {}]   ;;  %s817_s1 = inlined_call_operand.hbm [shape: f32[8,512], index: 1, kind: input, shape index: {}]   ;;  %s818_s2 = inlined_call_operand.hbm [shape: f32[8,512], index: 2, kind: input, shape index: {}]   ;;  %s819_s3 = inlined_call_operand.hbm [shape: f32[8,512], index: 3, kind: output, shape index: {0}]   ;;  %s820_s4 = inlined_call_operand.hbm [shape: f32[8,512], index: 4, kind: output, shape index: {1}]  }
   0x1   :  { %12 = vsyncpa [#allocation8], 0 }
   0x2   :  { %13 = vsyncpa [#allocation6], 0 }
   0x3   :  { %14 = vsyncpa [#allocation11], 0  ;;  %s620_s15 = smov [#allocation4]   ;;  %s621_s17 = smov [#allocation7]  }
   0x4   :  { %s21_s16 = sshll.u32 %s620_s15, 4  ;;  %s31_s18 = sshll.u32 %s621_s17, 4  ;;  %s22_s16 = int_to_ptr.vmem [resolvable:$true] %s21_s16  ;;  %s32_s18 = int_to_ptr.vmem [resolvable:$true] %s31_s18 }
   0x5   :  { %s540_s19 = scalar_lea.vmem %s22_s16, 512  ;;  %p545_p1 = scmp.lt.s32.totalorder %s22_s16, %s22_s16 }
   0x6   :  { %p541_p0 = scmp.ne.s32.totalorder %s22_s16, %s540_s19  ;;  %p546_p2 = scmp.lt.s32.totalorder %s540_s19, %s540_s19 }
   0x8   :  { %p547_p3 = por %p546_p2, %p545_p1 }
   0xa   :  { %p548_p4 = pnand %p547_p3, %p541_p0 }
   0xc   :  { %551 = shalt.err (!%p548_p4)
}
   0xd   :  { %24 = dma.hbm_to_vmem [thread:$0]  %s817_s1, 512, %s22_s16, [#allocation5]  }
   0xe   :  { %s560_s22 = scalar_lea.vmem %s32_s18, 512  ;;  %p565_p6 = scmp.lt.s32.totalorder %s32_s18, %s32_s18 }
   0xf   :  { %p561_p5 = scmp.ne.s32.totalorder %s32_s18, %s560_s22  ;;  %p566_p7 = scmp.lt.s32.totalorder %s560_s22, %s560_s22 }
  0x11   :  { %p567_p8 = por %p566_p7, %p565_p6 }
  0x13   :  { %p568_p9 = pnand %p567_p8, %p561_p5 }
  0x15   :  { %571 = shalt.err (!%p568_p9)
}
  0x16   :  { %34 = dma.hbm_to_vmem [thread:$0]  %s818_s2, 512, %s32_s18, [#allocation8]  }
  0x17   :  { %612 = dma.done.wait [#allocation5], 512  }
  0x18   :  { %613 = vsyncadd [#allocation5], 4294966784 }
  0x19   :  { %614 = dma.done.wait [#allocation8], 512  }
  0x1a   :  { %615 = vsyncadd [#allocation8], 4294966784  ;;  %v42_v0 = vlaneseq  ;;  %s57_s1 = sxor.u32 2654435769, %s816_s0  ;;  %s622_s10 = smov [#allocation10]  }
  0x1b   :  { %s58_s27 = sshra.s32 %s57_s1, 16  ;;  %s450_s11 = sshll.u32 %s622_s10, 4  ;;  %s451_s11 = int_to_ptr.vmem [resolvable:$true] %s450_s11 }
  0x1c   :  { %s59_s28 = sand.u32 65535, %s58_s27  ;;  %v43_v1 = vshrl.u32 %v42_v0, 7  ;;  %v45_v2 = vand.u32 127, %v42_v0  ;;  %s623_s12 = smov [#allocation9]  }
  0x1d   :  { %s60_s29 = sxor.u32 %s59_s28, %s57_s1  ;;  %s440_s13 = sshll.u32 %s623_s12, 4  ;;  %s441_s13 = int_to_ptr.vmem [resolvable:$true] %s440_s13 }
  0x1e   :  { %s61_s30 = smul.u32 2146121005, %s60_s29  ;;  %v49_v3 = vmul.u32 512, %v43_v1  ;;  %v46_v4 = vadd.s32 128, %v45_v2  ;;  %v47_v5 = vadd.s32 256, %v45_v2  ;;  %v48_v6 = vadd.s32 384, %v45_v2  ;;  %p577_p11 = scmp.lt.s32.totalorder %s451_s11, %s451_s11 }
  0x1f   :  { %s572_s14 = scalar_lea.vmem %s451_s11, 512 }
  0x20   :  { %s62_s5 = sshra.s32 %s61_s30, 15  ;;  %v52_v7 = vadd.s32 %v49_v3, %v45_v2  ;;  %v53_v8 = vadd.s32 %v49_v3, %v46_v4  ;;  %v54_v9 = vadd.s32 %v49_v3, %v47_v5  ;;  %v55_v10 = vadd.s32 %v49_v3, %v48_v6  ;;  %p573_p10 = scmp.ne.s32.totalorder %s451_s11, %s572_s14 }
  0x21   :  { %s63_s6 = sand.u32 131071, %s62_s5  ;;  %p578_p12 = scmp.lt.s32.totalorder %s572_s14, %s572_s14 }
  0x22   :  { %s64_s2 = sxor.u32 %s63_s6, %s61_s30 }
  0x23   :  { %s65_s7 = smul.u32 2221713035, %s64_s2  ;;  %p579_p13 = por %p578_p12, %p577_p11 }
  0x25   :  { %s66_s8 = sshra.s32 %s65_s7, 16  ;;  %p580_p0 = pnand %p579_p13, %p573_p10 }
  0x26   :  { %s67_s0 = sand.u32 65535, %s66_s8 }
  0x27   :  { %s68_s9 = sxor.u32 %s67_s0, %s65_s7 }
  0x28   :  { %v69_v11 = vstv %s68_s9 }
  0x29   :  { %v70_v12 = vxor.u32 %v69_v11, %v52_v7  ;;  %v71_v13 = vxor.u32 %v69_v11, %v53_v8  ;;  %v72_v14 = vxor.u32 %v69_v11, %v54_v9  ;;  %v73_v15 = vxor.u32 %v69_v11, %v55_v10 }
  0x2b   :  { %v464_v16 = vshrl.u32 %v70_v12, 16  ;;  %v465_v17 = vshrl.u32 %v71_v13, 16  ;;  %v466_v18 = vshrl.u32 %v72_v14, 16  ;;  %v467_v19 = vshrl.u32 %v73_v15, 16 }
  0x2d   :  { %v82_v20 = vxor.u32 %v464_v16, %v70_v12  ;;  %v83_v21 = vxor.u32 %v465_v17, %v71_v13  ;;  %v84_v22 = vxor.u32 %v466_v18, %v72_v14  ;;  %v85_v23 = vxor.u32 %v467_v19, %v73_v15 }
  0x2f   :  { %v86_v24 = vmul.u32 2146121005, %v82_v20  ;;  %v87_v25 = vmul.u32 2146121005, %v83_v21 }
  0x30   :  { %v88_v26 = vmul.u32 2146121005, %v84_v22  ;;  %v89_v27 = vmul.u32 2146121005, %v85_v23 }
  0x31   :  { %v468_v28 = vshrl.u32 %v86_v24, 15  ;;  %v469_v29 = vshrl.u32 %v87_v25, 15 }
  0x32   :  { %v470_v30 = vshrl.u32 %v88_v26, 15  ;;  %v471_v31 = vshrl.u32 %v89_v27, 15 }
  0x33   :  { %v98_v32 = vxor.u32 %v468_v28, %v86_v24  ;;  %v99_v33 = vxor.u32 %v469_v29, %v87_v25 }
  0x34   :  { %v100_v34 = vxor.u32 %v470_v30, %v88_v26  ;;  %v101_v35 = vxor.u32 %v471_v31, %v89_v27 }
  0x35   :  { %v102_v36 = vmul.u32 2221713035, %v98_v32  ;;  %v103_v37 = vmul.u32 2221713035, %v99_v33 }
  0x36   :  { %v104_v38 = vmul.u32 2221713035, %v100_v34  ;;  %v105_v39 = vmul.u32 2221713035, %v101_v35 }
  0x37   :  { %v472_v40 = vshrl.u32 %v102_v36, 16  ;;  %v473_v41 = vshrl.u32 %v103_v37, 16 }
  0x38   :  { %v474_v42 = vshrl.u32 %v104_v38, 16  ;;  %v475_v43 = vshrl.u32 %v105_v39, 16 }
  0x39   :  { %v114_v44 = vxor.u32 %v472_v40, %v102_v36  ;;  %v115_v45 = vxor.u32 %v473_v41, %v103_v37 }
  0x3a   :  { %v116_v46 = vxor.u32 %v474_v42, %v104_v38  ;;  %v117_v47 = vxor.u32 %v475_v43, %v105_v39 }
  0x3b   :  { %v118_v48 = vadd.s32 %v114_v44, %v69_v11  ;;  %v119_v49 = vadd.s32 %v115_v45, %v69_v11 }
  0x3c   :  { %v120_v50 = vadd.s32 %v116_v46, %v69_v11  ;;  %v121_v51 = vadd.s32 %v117_v47, %v69_v11 }
  0x3d   :  { %v476_v52 = vshrl.u32 %v118_v48, 16  ;;  %v477_v53 = vshrl.u32 %v119_v49, 16 }
  0x3e   :  { %v478_v54 = vshrl.u32 %v120_v50, 16  ;;  %v479_v55 = vshrl.u32 %v121_v51, 16 }
  0x3f   :  { %v130_v56 = vxor.u32 %v476_v52, %v118_v48  ;;  %v131_v57 = vxor.u32 %v477_v53, %v119_v49 }
  0x40   :  { %v132_v58 = vxor.u32 %v478_v54, %v120_v50  ;;  %v133_v59 = vxor.u32 %v479_v55, %v121_v51 }
  0x41   :  { %v134_v60 = vmul.u32 2146121005, %v130_v56  ;;  %v135_v61 = vmul.u32 2146121005, %v131_v57 }
  0x42   :  { %v136_v62 = vmul.u32 2146121005, %v132_v58  ;;  %v137_v63 = vmul.u32 2146121005, %v133_v59 }
  0x43   :  { %v480_v0 = vshrl.u32 %v134_v60, 15  ;;  %v481_v1 = vshrl.u32 %v135_v61, 15 }
  0x44   :  { %v482_v2 = vshrl.u32 %v136_v62, 15  ;;  %v483_v3 = vshrl.u32 %v137_v63, 15 }
  0x45   :  { %v146_v4 = vxor.u32 %v480_v0, %v134_v60  ;;  %v147_v5 = vxor.u32 %v481_v1, %v135_v61 }
  0x46   :  { %v148_v6 = vxor.u32 %v482_v2, %v136_v62  ;;  %v149_v7 = vxor.u32 %v483_v3, %v137_v63 }
  0x47   :  { %v150_v8 = vmul.u32 2221713035, %v146_v4  ;;  %v151_v9 = vmul.u32 2221713035, %v147_v5 }
  0x48   :  { %v152_v10 = vmul.u32 2221713035, %v148_v6  ;;  %v153_v11 = vmul.u32 2221713035, %v149_v7 }
  0x49   :  { %v484_v12 = vshrl.u32 %v150_v8, 16  ;;  %v485_v13 = vshrl.u32 %v151_v9, 16 }
  0x4a   :  { %v486_v14 = vshrl.u32 %v152_v10, 16  ;;  %v487_v15 = vshrl.u32 %v153_v11, 16 }
  0x4b   :  { %v162_v16 = vxor.u32 %v484_v12, %v150_v8  ;;  %v163_v17 = vxor.u32 %v485_v13, %v151_v9 }
  0x4c   :  { %v164_v18 = vxor.u32 %v486_v14, %v152_v10  ;;  %v165_v19 = vxor.u32 %v487_v15, %v153_v11 }
  0x4d   :  { %v488_v20 = vshrl.u32 %v162_v16, 8  ;;  %v489_v21 = vshrl.u32 %v163_v17, 8 }
  0x4e   :  { %v490_v22 = vshrl.u32 %v164_v18, 8  ;;  %v491_v23 = vshrl.u32 %v165_v19, 8 }
  0x4f   :  { %v174_v24 = vcvt.s32.f32 %v488_v20  ;;  %v175_v25 = vcvt.s32.f32 %v489_v21 }
  0x50   :  { %v176_v26 = vcvt.s32.f32 %v490_v22  ;;  %v177_v27 = vcvt.s32.f32 %v491_v23 }
  0x51   :  { %v178_v28 = vadd.f32 0.5, %v174_v24  ;;  %v179_v29 = vadd.f32 0.5, %v175_v25 }
  0x52   :  { %v180_v30 = vadd.f32 0.5, %v176_v26  ;;  %v181_v31 = vadd.f32 0.5, %v177_v27 }
  0x53   :  { %v182_v32 = vmul.f32 5.9604645e-08, %v178_v28  ;;  %v183_v33 = vmul.f32 5.9604645e-08, %v179_v29 }
  0x54   :  { %v184_v34 = vmul.f32 5.9604645e-08, %v180_v30  ;;  %v185_v35 = vmul.f32 5.9604645e-08, %v181_v31 }
  0x55   :  { %v186_v36 = vmul.f32 2.0, %v182_v32  ;;  %v187_v37 = vmul.f32 2.0, %v183_v33 }
  0x56   :  { %v188_v38 = vmul.f32 2.0, %v184_v34  ;;  %v189_v39 = vmul.f32 2.0, %v185_v35 }
  0x57   :  { %v658_v40 = vadd.f32 -1.0, %v186_v36  ;;  %v660_v41 = vadd.f32 -1.0, %v187_v37 }
  0x58   :  { %v662_v42 = vadd.f32 -1.0, %v188_v38  ;;  %v664_v43 = vadd.f32 -1.0, %v189_v39 }
  0x59   :  { %v194_v44 = vsub.f32 1.0, %v658_v40  ;;  %v198_v45 = vadd.f32 1.0, %v658_v40  ;;  %v195_v46 = vsub.f32 1.0, %v660_v41  ;;  %v199_v47 = vadd.f32 1.0, %v660_v41 }
  0x5a   :  { %v196_v48 = vsub.f32 1.0, %v662_v42  ;;  %v200_v49 = vadd.f32 1.0, %v662_v42  ;;  %v197_v50 = vsub.f32 1.0, %v664_v43  ;;  %v201_v51 = vadd.f32 1.0, %v664_v43 }
  0x5b   :  { %v202_v52 = vmul.f32 %v198_v45, %v194_v44  ;;  %v203_v53 = vmul.f32 %v199_v47, %v195_v46 }
  0x5c   :  { %v204_v54 = vmul.f32 %v200_v49, %v196_v48  ;;  %v205_v55 = vmul.f32 %v201_v51, %v197_v50 }
  0x5d   :  { %508 = vlog2.f32 %v202_v52 }
  0x5e   :  { %510 = vlog2.f32 %v203_v53 }
  0x5f   :  { %512 = vlog2.f32 %v204_v54 }
  0x60   :  { %514 = vlog2.f32 %v205_v55 }
  0x6a   :  { %v509_v56 = vpop.eup %508 }
  0x6b   :  { %v511_v57 = vpop.eup %510  ;;  %v207_v58 = vmul.f32 0.6931472, %v509_v56 }
  0x6c   :  { %v513_v59 = vpop.eup %512  ;;  %v209_v60 = vmul.f32 0.6931472, %v511_v57 }
  0x6d   :  { %v515_v61 = vpop.eup %514  ;;  %v674_v62 = vsub.f32 0.0, %v207_v58  ;;  %v211_v0 = vmul.f32 0.6931472, %v513_v59 }
  0x6e   :  { %v676_v63 = vsub.f32 0.0, %v209_v60  ;;  %v213_v2 = vmul.f32 0.6931472, %v515_v61 }
  0x6f   :  { %v679_v1 = vadd.f32 -2.5, %v674_v62  ;;  %516 = vrsqrt.f32 %v674_v62  ;;  %v688_v6 = vsub.f32 0.0, %v211_v0  ;;  %vm288_vm0 = vcmp.eq.f32.partialorder %v674_v62, inf }
  0x70   :  { %v683_v3 = vadd.f32 -2.5, %v676_v63  ;;  %518 = vrsqrt.f32 %v676_v63  ;;  %v690_v8 = vsub.f32 0.0, %v213_v2  ;;  %vm290_vm1 = vcmp.eq.f32.partialorder %v674_v62, 0.0 }
  0x71   :  { %v222_v4 = vmul.f32 2.8102264e-08, %v679_v1  ;;  %v693_v10 = vadd.f32 -2.5, %v688_v6  ;;  %520 = vrsqrt.f32 %v688_v6  ;;  %v291_v24 = vand.u32 2147483648, %v674_v62 }
  0x72   :  { %v223_v5 = vmul.f32 2.8102264e-08, %v683_v3  ;;  %v700_v14 = vadd.f32 -2.5, %v690_v8  ;;  %522 = vrsqrt.f32 %v690_v8  ;;  %vm295_vm2 = vcmp.eq.f32.partialorder %v676_v63, inf }
  0x73   :  { %v226_v7 = vadd.f32 3.4327394e-07, %v222_v4  ;;  %v224_v13 = vmul.f32 2.8102264e-08, %v693_v10  ;;  %vm297_vm3 = vcmp.eq.f32.partialorder %v676_v63, 0.0  ;;  %v298_v32 = vand.u32 2147483648, %v676_v63 }
  0x74   :  { %v227_v9 = vadd.f32 3.4327394e-07, %v223_v5  ;;  %v225_v18 = vmul.f32 2.8102264e-08, %v700_v14  ;;  %vm302_vm4 = vcmp.eq.f32.partialorder %v688_v6, inf  ;;  %v305_v50 = vand.u32 2147483648, %v688_v6 }
  0x75   :  { %v230_v11 = vmul.f32 %v679_v1, %v226_v7  ;;  %v228_v17 = vadd.f32 3.4327394e-07, %v224_v13  ;;  %vm304_vm5 = vcmp.eq.f32.partialorder %v688_v6, 0.0  ;;  %vm309_vm6 = vcmp.eq.f32.partialorder %v690_v8, inf }
  0x76   :  { %v231_v12 = vmul.f32 %v683_v3, %v227_v9  ;;  %v229_v22 = vadd.f32 3.4327394e-07, %v225_v18  ;;  %vm311_vm7 = vcmp.eq.f32.partialorder %v690_v8, 0.0  ;;  %v312_v9 = vand.u32 2147483648, %v690_v8 }
  0x77   :  { %v234_v15 = vadd.f32 -3.5233877e-06, %v230_v11  ;;  %v232_v21 = vmul.f32 %v693_v10, %v228_v17  ;;  %vm382_vm8 = vcmp.lt.f32.partialorder %v674_v62, 5.0  ;;  %vm383_vm9 = vcmp.lt.f32.partialorder %v676_v63, 5.0 }
  0x78   :  { %v235_v16 = vadd.f32 -3.5233877e-06, %v231_v12  ;;  %v233_v28 = vmul.f32 %v700_v14, %v229_v22  ;;  %vm384_vm10 = vcmp.lt.f32.partialorder %v688_v6, 5.0  ;;  %vm385_vm11 = vcmp.lt.f32.partialorder %v690_v8, 5.0 }
  0x79   :  { %v238_v19 = vmul.f32 %v679_v1, %v234_v15  ;;  %v236_v27 = vadd.f32 -3.5233877e-06, %v232_v21 }
  0x7a   :  { %v239_v20 = vmul.f32 %v683_v3, %v235_v16  ;;  %v237_v36 = vadd.f32 -3.5233877e-06, %v233_v28 }
  0x7b   :  { %v242_v23 = vadd.f32 -4.3915065e-06, %v238_v19  ;;  %v240_v35 = vmul.f32 %v693_v10, %v236_v27 }
  0x7c   :  { %v517_v25 = vpop.eup %516  ;;  %v243_v26 = vadd.f32 -4.3915065e-06, %v239_v20  ;;  %v241_v51 = vmul.f32 %v700_v14, %v237_v36 }
  0x7d   :  { %v519_v29 = vpop.eup %518  ;;  %v246_v30 = vmul.f32 %v679_v1, %v242_v23  ;;  %v287_v31 = vmul.f32 %v517_v25, %v674_v62  ;;  %v244_v46 = vadd.f32 -4.3915065e-06, %v240_v35 }
  0x7e   :  { %v247_v33 = vmul.f32 %v683_v3, %v243_v26  ;;  %v294_v34 = vmul.f32 %v519_v29, %v676_v63  ;;  %v521_v47 = vpop.eup %520  ;;  %v245_v57 = vadd.f32 -4.3915065e-06, %v241_v51  ;;  %v398_v26 = vld [vmem:[#allocation7] sm:$0xff] }
  0x7f   :  { %v250_v37 = vadd.f32 0.00021858087, %v246_v30  ;;  %v289_v38 = vsel %vm288_vm0, %v674_v62, %v287_v31  ;;  %v248_v53 = vmul.f32 %v693_v10, %v244_v46  ;;  %v301_v54 = vmul.f32 %v521_v47, %v688_v6  ;;  %v523_v58 = vpop.eup %522  ;;  %v414_v62 = vld [vmem:[#allocation4] sm:$0xff] }
  0x80   :  { %v292_v39 = vsel %vm290_vm1, %v291_v24, %v289_v38  ;;  %v251_v44 = vadd.f32 0.00021858087, %v247_v33  ;;  %v296_v45 = vsel %vm295_vm2, %v676_v63, %v294_v34  ;;  %v249_v13 = vmul.f32 %v700_v14, %v245_v57  ;;  %v399_v34 = vld [vmem:[#allocation7 + $0x8] sm:$0xff] }
  0x81   :  { %v728_v48 = vadd.f32 -3.0, %v292_v39  ;;  %v299_v49 = vsel %vm297_vm3, %v298_v32, %v296_v45  ;;  %v254_v55 = vmul.f32 %v679_v1, %v250_v37  ;;  %v252_v61 = vadd.f32 0.00021858087, %v248_v53  ;;  %v400_v39 = vld [vmem:[#allocation7 + $0x10] sm:$0xff] }
  0x82   :  { %v732_v52 = vadd.f32 -3.0, %v299_v49  ;;  %v255_v59 = vmul.f32 %v683_v3, %v251_v44  ;;  %v303_v0 = vsel %vm302_vm4, %v688_v6, %v301_v54  ;;  %v308_v15 = vmul.f32 %v523_v58, %v690_v8 }
  0x83   :  { %v318_v56 = vmul.f32 -0.00020021426, %v728_v48  ;;  %v306_v4 = vsel %vm304_vm5, %v305_v50, %v303_v0  ;;  %v258_v11 = vadd.f32 -0.001253725, %v254_v55  ;;  %v256_v18 = vmul.f32 %v693_v10, %v252_v61 }
  0x84   :  { %v319_v60 = vmul.f32 -0.00020021426, %v732_v52  ;;  %v745_v7 = vadd.f32 -3.0, %v306_v4  ;;  %v259_v16 = vadd.f32 -0.001253725, %v255_v59  ;;  %v310_v21 = vsel %vm309_vm6, %v690_v8, %v308_v15 }
  0x85   :  { %v322_v2 = vadd.f32 0.00010095056, %v318_v56  ;;  %v262_v24 = vmul.f32 %v679_v1, %v258_v11  ;;  %v253_v27 = vadd.f32 0.00021858087, %v249_v13  ;;  %v313_v28 = vsel %vm311_vm7, %v312_v9, %v310_v21 }
  0x86   :  { %v323_v5 = vadd.f32 0.00010095056, %v319_v60  ;;  %v320_v19 = vmul.f32 -0.00020021426, %v745_v7  ;;  %v263_v29 = vmul.f32 %v683_v3, %v259_v16  ;;  %v260_v31 = vadd.f32 -0.001253725, %v256_v18 }
  0x87   :  { %v326_v12 = vmul.f32 %v728_v48, %v322_v2  ;;  %v763_v35 = vadd.f32 -3.0, %v313_v28  ;;  %v402_v36 = vmul.f32 0.5, %v398_v26  ;;  %v266_v44 = vadd.f32 -0.0041776816, %v262_v24 }
  0x88   :  { %v327_v17 = vmul.f32 %v732_v52, %v323_v5  ;;  %v324_v23 = vadd.f32 0.00010095056, %v320_v19  ;;  %v257_v46 = vmul.f32 %v700_v14, %v253_v27  ;;  %v267_v49 = vadd.f32 -0.0041776816, %v263_v29  ;;  %v401_v5 = vld [vmem:[#allocation7 + $0x18] sm:$0xff] }
  0x89   :  { %v330_v20 = vadd.f32 0.0013493432, %v326_v12  ;;  %v321_v47 = vmul.f32 -0.00020021426, %v763_v35  ;;  %v264_v51 = vmul.f32 %v693_v10, %v260_v31  ;;  %v403_v55 = vmul.f32 0.5, %v399_v34 }
  0x8a   :  { %v331_v22 = vadd.f32 0.0013493432, %v327_v17  ;;  %v328_v32 = vmul.f32 %v745_v7, %v324_v23  ;;  %v404_v56 = vmul.f32 0.5, %v400_v39  ;;  %v406_v58 = vmul.f32 1.442695, %v402_v36 }
  0x8b   :  { %v334_v25 = vmul.f32 %v728_v48, %v330_v20  ;;  %v325_v57 = vadd.f32 0.00010095056, %v321_v47  ;;  %v270_v61 = vmul.f32 %v679_v1, %v266_v44  ;;  %v261_v2 = vadd.f32 -0.001253725, %v257_v46 }
  0x8c   :  { %v335_v30 = vmul.f32 %v732_v52, %v331_v22  ;;  %v332_v38 = vadd.f32 0.0013493432, %v328_v32  ;;  %v271_v9 = vmul.f32 %v683_v3, %v267_v49  ;;  %v268_v12 = vadd.f32 -0.0041776816, %v264_v51 }
  0x8d   :  { %v338_v33 = vadd.f32 -0.0036734284, %v334_v25  ;;  %v329_v4 = vmul.f32 %v763_v35, %v325_v57  ;;  %v408_v16 = vmul.f32 1.442695, %v403_v55  ;;  %524 = vpow2.f32 %v406_v58 }
  0x8e   :  { %v339_v37 = vadd.f32 -0.0036734284, %v335_v30  ;;  %v336_v53 = vmul.f32 %v745_v7, %v332_v38  ;;  %v405_v20 = vmul.f32 0.5, %v401_v5  ;;  %v274_v21 = vadd.f32 0.24664073, %v270_v61 }
  0x8f   :  { %v342_v45 = vmul.f32 %v728_v48, %v338_v33  ;;  %v333_v17 = vadd.f32 0.0013493432, %v329_v4  ;;  %v265_v23 = vmul.f32 %v700_v14, %v261_v2  ;;  %v275_v25 = vadd.f32 0.24664073, %v271_v9 }
  0x90   :  { %v343_v50 = vmul.f32 %v732_v52, %v339_v37  ;;  %v340_v60 = vadd.f32 -0.0036734284, %v336_v53  ;;  %v272_v27 = vmul.f32 %v693_v10, %v268_v12  ;;  %526 = vpow2.f32 %v408_v16 }
  0x91   :  { %v346_v54 = vadd.f32 0.0057395077, %v342_v45  ;;  %v337_v24 = vmul.f32 %v763_v35, %v333_v17  ;;  %v410_v30 = vmul.f32 1.442695, %v404_v56  ;;  %v278_v34 = vmul.f32 %v679_v1, %v274_v21 }
  0x92   :  { %v347_v59 = vadd.f32 0.0057395077, %v343_v50  ;;  %v344_v13 = vmul.f32 %v745_v7, %v340_v60  ;;  %v269_v37 = vadd.f32 -0.0041776816, %v265_v23  ;;  %v279_v39 = vmul.f32 %v683_v3, %v275_v25 }
  0x93   :  { %v350_v0 = vmul.f32 %v728_v48, %v346_v54  ;;  %v341_v31 = vadd.f32 -0.0036734284, %v337_v24  ;;  %v276_v45 = vadd.f32 0.24664073, %v272_v27  ;;  %528 = vpow2.f32 %v410_v30 }
  0x94   :  { %v351_v11 = vmul.f32 %v732_v52, %v347_v59  ;;  %v348_v19 = vadd.f32 0.0057395077, %v344_v13  ;;  %v412_v50 = vmul.f32 1.442695, %v405_v20  ;;  %v282_v53 = vadd.f32 1.5014094, %v278_v34 }
  0x95   :  { %v354_v15 = vadd.f32 -0.0076224613, %v350_v0  ;;  %v345_v38 = vmul.f32 %v763_v35, %v341_v31  ;;  %v273_v55 = vmul.f32 %v700_v14, %v269_v37  ;;  %v283_v56 = vadd.f32 1.5014094, %v279_v39 }
  0x96   :  { %v355_v18 = vadd.f32 -0.0076224613, %v351_v11  ;;  %v352_v28 = vmul.f32 %v745_v7, %v348_v19  ;;  %v280_v58 = vmul.f32 %v693_v10, %v276_v45  ;;  %530 = vpow2.f32 %v412_v50 }
  0x97   :  { %v358_v22 = vmul.f32 %v728_v48, %v354_v15  ;;  %v349_v49 = vadd.f32 0.0057395077, %v345_v38  ;;  %v277_v5 = vadd.f32 0.24664073, %v273_v55 }
  0x98   :  { %v359_v26 = vmul.f32 %v732_v52, %v355_v18  ;;  %v356_v33 = vadd.f32 -0.0076224613, %v352_v28  ;;  %v284_v10 = vadd.f32 1.5014094, %v280_v58 }
  0x99   :  { %v362_v29 = vadd.f32 0.0094388705, %v358_v22  ;;  %v353_v3 = vmul.f32 %v763_v35, %v349_v49  ;;  %v281_v19 = vmul.f32 %v700_v14, %v277_v5  ;;  %v416_v14 = vld [vmem:[#allocation4 + $0x10] sm:$0xff] }
  0x9a   :  { %v363_v32 = vadd.f32 0.0094388705, %v359_v26  ;;  %v360_v46 = vmul.f32 %v745_v7, %v356_v33  ;;  %v525_v4 = vpop.eup %524 }
  0x9b   :  { %v366_v36 = vmul.f32 %v728_v48, %v362_v29  ;;  %v357_v61 = vadd.f32 -0.0076224613, %v353_v3  ;;  %v285_v27 = vadd.f32 1.5014094, %v281_v19 }
  0x9c   :  { %v367_v44 = vmul.f32 %v732_v52, %v363_v32  ;;  %v364_v1 = vadd.f32 0.0094388705, %v360_v46 }
  0x9d   :  { %v370_v47 = vadd.f32 1.001674, %v366_v36  ;;  %v361_v9 = vmul.f32 %v763_v35, %v357_v61  ;;  %v527_v15 = vpop.eup %526  ;;  %v417_v36 = vld [vmem:[#allocation4 + $0x18] sm:$0xff] }
  0x9e   :  { %v371_v51 = vadd.f32 1.001674, %v367_v44  ;;  %v368_v59 = vmul.f32 %v745_v7, %v364_v1 }
  0x9f   :  { %v374_v54 = vmul.f32 %v728_v48, %v370_v47  ;;  %v365_v63 = vadd.f32 0.0094388705, %v361_v9 }
  0xa0   :  { %v375_v57 = vmul.f32 %v732_v52, %v371_v51  ;;  %v372_v2 = vadd.f32 1.001674, %v368_v59  ;;  %v529_v6 = vpop.eup %528 }
  0xa1   :  { %v378_v60 = vadd.f32 2.8329768, %v374_v54  ;;  %v369_v20 = vmul.f32 %v763_v35, %v365_v63 }
  0xa2   :  { %v379_v0 = vadd.f32 2.8329768, %v375_v57  ;;  %v376_v12 = vmul.f32 %v745_v7, %v372_v2 }
  0xa3   :  { %v386_v48 = vsel %vm382_vm8, %v282_v53, %v378_v60  ;;  %v373_v7 = vadd.f32 1.001674, %v369_v20 }
  0xa4   :  { %v390_v52 = vmul.f32 %v658_v40, %v386_v48  ;;  %v387_v11 = vsel %vm383_vm9, %v283_v56, %v379_v0  ;;  %v380_v17 = vadd.f32 2.8329768, %v376_v12  ;;  %v415_v40 = vld [vmem:[#allocation4 + $0x8] sm:$0xff] }
  0xa5   :  { %v391_v13 = vmul.f32 %v660_v41, %v387_v11  ;;  %v377_v28 = vmul.f32 %v763_v35, %v373_v7 }
  0xa6   :  { %v394_v16 = vmul.f32 1.4142135, %v390_v52  ;;  %v388_v22 = vsel %vm384_vm10, %v284_v10, %v380_v17 }
  0xa7   :  { %v395_v18 = vmul.f32 1.4142135, %v391_v13  ;;  %v392_v41 = vmul.f32 %v662_v42, %v388_v22  ;;  %v381_v30 = vadd.f32 2.8329768, %v377_v28  ;;  %v531_v42 = vpop.eup %530 }
  0xa8   :  { %v418_v21 = vmul.f32 %v525_v4, %v394_v16  ;;  %430 = vst [vmem:[#allocation10] sm:$0xff] %v394_v16 }
  0xa9   :  { %v419_v23 = vmul.f32 %v527_v15, %v395_v18  ;;  %431 = vst [vmem:[#allocation10 + $0x8] sm:$0xff] %v395_v18  ;;  %v396_v26 = vmul.f32 1.4142135, %v392_v41  ;;  %v389_v32 = vsel %vm385_vm11, %v285_v27, %v381_v30 }
  0xaa   :  { %v422_v24 = vadd.f32 %v418_v21, %v414_v62  ;;  %v393_v33 = vmul.f32 %v664_v43, %v389_v32 }
  0xab   :  { %v423_v25 = vadd.f32 %v419_v23, %v415_v40  ;;  %v420_v29 = vmul.f32 %v529_v6, %v396_v26  ;;  %432 = vst [vmem:[#allocation10 + $0x10] sm:$0xff] %v396_v26 }
  0xac   :  { %426 = vst [vmem:[#allocation9] sm:$0xff] %v422_v24  ;;  %v397_v34 = vmul.f32 1.4142135, %v393_v33 }
  0xad   :  { %427 = vst [vmem:[#allocation9 + $0x8] sm:$0xff] %v423_v25  ;;  %v424_v31 = vadd.f32 %v420_v29, %v416_v14 }
  0xae   :  { %v421_v35 = vmul.f32 %v531_v42, %v397_v34  ;;  %433 = vst [vmem:[#allocation10 + $0x18] sm:$0xff] %v397_v34 }
  0xaf   :  { %428 = vst [vmem:[#allocation9 + $0x10] sm:$0xff] %v424_v31 }
  0xb0   :  { %583 = shalt.err (!%p580_p0)
}
  0xb1   :  { %453 = dma.vmem_to_hbm [thread:$0]  %s451_s11, 512, %s820_s4, [#allocation11]   ;;  %v425_v43 = vadd.f32 %v421_v35, %v417_v36 }
  0xb2   :  { %s592_s17 = scalar_lea.vmem %s441_s13, 512  ;;  %p597_p2 = scmp.lt.s32.totalorder %s441_s13, %s441_s13 }
  0xb3   :  { %429 = vst [vmem:[#allocation9 + $0x18] sm:$0xff] %v425_v43  ;;  %p593_p1 = scmp.ne.s32.totalorder %s441_s13, %s592_s17  ;;  %p598_p3 = scmp.lt.s32.totalorder %s592_s17, %s592_s17 }
  0xb5   :  { %p599_p4 = por %p598_p3, %p597_p2 }
  0xb7   :  { %p600_p5 = pnand %p599_p4, %p593_p1 }
  0xb9   :  { %603 = shalt.err (!%p600_p5)
}
  0xba   :  { %443 = dma.vmem_to_hbm [thread:$0]  %s441_s13, 512, %s819_s3, [#allocation6]  }
  0xbb   :  { %616 = dma.done.wait [#allocation6], 512  }
  0xbc   :  { %617 = vsyncadd [#allocation6], 4294966784 }
  0xbd   :  { %618 = dma.done.wait [#allocation11], 512  }
  0xbe   :  { %619 = vsyncadd [#allocation11], 4294966784 }
  0xbf   :  { %460 = vsyncpa [#allocation5], 1 }
  0xc0   :  { %461 = vsyncpa [#allocation8], 1 }
  0xc1   :  { %462 = vsyncpa [#allocation6], 1 }
  0xc2   :  { %463 = vsyncpa [#allocation11], 1 }

</bundles_post_ra>
